<compile_context>
chip_gen: v6e
topology: v6e:2x2x1
jax: 0.10.0
libtpu: 0.0.40
codegen_flags: <defaults>
</compile_context>

<pallas_src>
import jax
import jax.numpy as jnp
import numpy as np
from jax.experimental import pallas as pl
from jax.experimental.pallas import tpu as pltpu

SMOOTH = 1e-05


def _mtl_partials_kernel(o1_ref, o2_ref, tgt_ref, part_ref):
    """One spatial tile -> 4 partial sums (sel1, sum(o1), sel2, sum(o2)).

    Each partial is written as a full (8, 128) splat so the output BlockSpec
    stays (8, 128)-aligned; the wrapper reads element [0, 0] of each slab.
    """
    tgt = tgt_ref[...]                     # (N, T) integer labels
    # Post-remap labels are binary, so the one-hot-selected probability is
    # channel 0 or channel 1 only.
    label1 = tgt >= 1                      # task 1: target >= 1 -> class 1
    label2 = tgt >= 2                      # task 2: additionally target == 1 -> class 0

    o1_c0 = o1_ref[:, 0, :].astype(jnp.float32)
    o1_c1 = o1_ref[:, 1, :].astype(jnp.float32)
    o2_c0 = o2_ref[:, 0, :].astype(jnp.float32)
    o2_c1 = o2_ref[:, 1, :].astype(jnp.float32)

    sel1 = jnp.where(label1, o1_c1, o1_c0)           # (N, T)
    sel2 = jnp.where(label2, o2_c1, o2_c0)           # (N, T)

    sel1_s = jnp.sum(sel1)
    sum1_s = jnp.sum(o1_ref[...].astype(jnp.float32))
    sel2_s = jnp.sum(sel2)
    sum2_s = jnp.sum(o2_ref[...].astype(jnp.float32))

    part_ref[0, 0] = jnp.full((8, 128), sel1_s, jnp.float32)
    part_ref[0, 1] = jnp.full((8, 128), sum1_s, jnp.float32)
    part_ref[0, 2] = jnp.full((8, 128), sel2_s, jnp.float32)
    part_ref[0, 3] = jnp.full((8, 128), sum2_s, jnp.float32)


def _round_up(v, m):
    return -(-v // m) * m


def _vmem_budget_bytes():
    """Generation-aware VMEM limit for this kernel (v5e/v6e: 128 MiB, v7x: 64 MiB)."""
    cap = None
    try:
        info = pltpu.get_tpu_info()
        cap = int(getattr(info, "vmem_capacity_bytes", 0)) or None
    except Exception:
        cap = None
    if cap is None:
        cap = 64 * 1024 * 1024                       # conservative: v7x-sized VMEM
    if cap >= 128 * 1024 * 1024:                     # v5e / v6e
        return 96 * 1024 * 1024
    return min(44 * 1024 * 1024, int(cap * 0.7))     # v7x (64 MiB per TensorCore)


def _pick_tile(hw_padded, n, c1, c2, max_tile_lanes, vmem_limit_bytes):
    """Largest 128-multiple lane tile dividing hw_padded under the VMEM budget."""
    # Padded VMEM bytes per lane-column for the double-buffered input blocks
    # (sublane dims round up to 8 in VMEM layout).
    bytes_per_lane = 2 * 4 * (n * _round_up(c1, 8) + n * _round_up(c2, 8) + _round_up(n, 8))
    budget = int(vmem_limit_bytes * 0.85)            # headroom for outputs / internal scratch
    max_t = max(128, budget // bytes_per_lane // 128 * 128)
    if max_tile_lanes is not None:
        max_t = min(max_t, max(128, (max_tile_lanes // 128) * 128))
    max_t = min(max_t, hw_padded)

    m = hw_padded // 128
    k = max(1, max_t // 128)
    while m % k:
        k -= 1
    # Prefer >= 2 grid steps for larger images so input DMA pipelines with
    # compute and both v7x TensorCores get work.
    if m // k == 1 and m >= 16:
        k = m // 2
        while m % k:
            k -= 1
    return 128 * k


def mtl_loss(output1, output2, target, *, max_tile_lanes=None):
    """Pallas implementation of MTLloss.forward. Returns a scalar float32."""
    n, c1, h, w = output1.shape
    n2, c2, h2, w2 = output2.shape
    assert (n2, h2, w2) == (n, h, w)
    # PyTorch's scatter_ with the remapped (binary) labels requires >= 2 channels.
    assert c1 >= 2 and c2 >= 2, "MTLloss needs at least 2 channels per task"
    hw = h * w

    # Lane-dense, copy-free reshapes (spatial axis last). No dtype casts here:
    # activations stream in their input dtype, target streams as provided.
    o1 = output1.reshape(n, c1, hw)
    o2 = output2.reshape(n, c2, hw)
    tgt = target.reshape(n, hw)

    hw_padded = _round_up(hw, 128)
    if hw_padded != hw:
        pad = hw_padded - hw
        # Zero probabilities + zero labels at padded positions contribute 0 to
        # every partial sum; the one-hot sum below uses the true n*h*w.
        o1 = jnp.pad(o1, ((0, 0), (0, 0), (0, pad)))
        o2 = jnp.pad(o2, ((0, 0), (0, 0), (0, pad)))
        tgt = jnp.pad(tgt, ((0, 0), (0, pad)))

    vmem_limit = _vmem_budget_bytes()
    t = _pick_tile(hw_padded, n, c1, c2, max_tile_lanes, vmem_limit)
    num_blocks = hw_padded // t

    parts = pl.pallas_call(
        _mtl_partials_kernel,
        out_shape=jax.ShapeDtypeStruct((num_blocks, 4, 8, 128), jnp.float32),
        grid=(num_blocks,),
        in_specs=[
            pl.BlockSpec((n, c1, t), lambda i: (0, 0, i)),
            pl.BlockSpec((n, c2, t), lambda i: (0, 0, i)),
            pl.BlockSpec((n, t), lambda i: (0, i)),
        ],
        out_specs=pl.BlockSpec((1, 4, 8, 128), lambda i: (i, 0, 0, 0)),
        compiler_params=pltpu.CompilerParams(
            dimension_semantics=("parallel",),
            vmem_limit_bytes=int(vmem_limit),
        ),
    )(o1, o2, tgt)

    # Tiny wrapper-side combine: (num_blocks, 4) scalars -> dice arithmetic.
    sums = jnp.sum(parts[:, :, 0, 0], axis=0)
    onehot_sum = jnp.float32(n * hw)   # one-hot targets sum to exactly one per pixel
    dice1 = (2.0 * sums[0] + SMOOTH) / (sums[1] + onehot_sum + SMOOTH)
    dice2 = (2.0 * sums[2] + SMOOTH) / (sums[3] + onehot_sum + SMOOTH)
    return 1.0 - 0.5 * (dice1 + dice2)


def mtl_loss_reference(output1, output2, target):
    """Pure-jnp reference replicating the PyTorch semantics (for validation)."""
    o1 = output1.astype(jnp.float32)
    o2 = output2.astype(jnp.float32)
    tgt = target.astype(jnp.int32)
    label1 = jnp.where(tgt >= 1, 1, tgt)
    label2 = jnp.where(tgt == 1, 0, label1)
    n, c1, h, w = o1.shape
    _, c2, _, _ = o2.shape
    t1 = (jnp.arange(c1)[None, :, None, None] == label1).astype(jnp.float32)
    t2 = (jnp.arange(c2)[None, :, None, None] == label2).astype(jnp.float32)
    dice1 = (2.0 * jnp.sum(o1 * t1) + SMOOTH) / (jnp.sum(o1) + jnp.sum(t1) + SMOOTH)
    dice2 = (2.0 * jnp.sum(o2 * t2) + SMOOTH) / (jnp.sum(o2) + jnp.sum(t2) + SMOOTH)
    return 1.0 - 0.5 * (dice1 + dice2)


if __name__ == "__main__":
    key = jax.random.PRNGKey(0)
    k1, k2, k3 = jax.random.split(key, 3)

    N, C1, C2, H, W = 2, 4, 2, 16, 16
    output1 = jax.random.uniform(k1, (N, C1, H, W), dtype=jnp.float32)
    output2 = jax.random.uniform(k2, (N, C2, H, W), dtype=jnp.float32)
    # integer labels in {0, 1, 2} so both remapping branches are exercised
    target = jax.random.randint(k3, (N, 1, H, W), minval=0, maxval=3,
                                dtype=jnp.int32)

    ref = jax.block_until_ready(mtl_loss_reference(output1, output2, target))

    # default tiling (single grid step at this small spatial size)
    loss = jax.block_until_ready(mtl_loss(output1, output2, target))
    # forced small tile -> multi-step grid, exercising per-block partials
    loss_tiled = jax.block_until_ready(
        mtl_loss(output1, output2, target, max_tile_lanes=128))

    # non-128-multiple spatial size exercises the zero-padding path
    Hp, Wp = 10, 10
    o1p = jax.random.uniform(k1, (N, C1, Hp, Wp), dtype=jnp.float32)
    o2p = jax.random.uniform(k2, (N, C2, Hp, Wp), dtype=jnp.float32)
    tp = jax.random.randint(k3, (N, 1, Hp, Wp), minval=0, maxval=3,
                            dtype=jnp.int32)
    ref_p = jax.block_until_ready(mtl_loss_reference(o1p, o2p, tp))
    loss_p = jax.block_until_ready(mtl_loss(o1p, o2p, tp))

    assert np.isfinite(float(loss)) and np.isfinite(float(loss_tiled))
    assert np.isfinite(float(loss_p))
    assert np.allclose(float(loss), float(ref), rtol=1e-5, atol=1e-6), (loss, ref)
    assert np.allclose(float(loss_tiled), float(ref), rtol=1e-5, atol=1e-6), (
        loss_tiled, ref)
    assert np.allclose(float(loss_p), float(ref_p), rtol=1e-5, atol=1e-6), (
        loss_p, ref_p)
    print("KERNEL_OK")
</pallas_src>

<mosaic_0001>
module attributes {stable_mosaic.version = 11 : i64} {
  func.func @_mtl_partials_kernel(%arg0: i32, %arg1: memref<2x4x256xf32, #tpu.memory_space<vmem>>, %arg2: memref<2x2x256xf32, #tpu.memory_space<vmem>>, %arg3: memref<2x256xi32, #tpu.memory_space<vmem>>, %arg4: memref<1x4x8x128xf32, #tpu.memory_space<vmem>>) attributes {dimension_semantics = [#tpu.dimension_semantics<parallel>], iteration_bounds = array<i64: 1>, scalar_prefetch = 0 : i64, scratch_operands = 0 : i64, tpu.core_type = #tpu.core_type<tc>, window_params = [{transform_indices = @transform_0, window_bounds = array<i64: 2, 4, 256>}, {transform_indices = @transform_1, window_bounds = array<i64: 2, 2, 256>}, {transform_indices = @transform_2, window_bounds = array<i64: 2, 256>}, {transform_indices = @transform_3, window_bounds = array<i64: 1, 4, 8, 128>}]} {
    %c0 = arith.constant 0 : index
    %c0_0 = arith.constant 0 : index
    %0 = vector.load %arg3[%c0, %c0_0] : memref<2x256xi32, #tpu.memory_space<vmem>>, vector<2x256xi32>
    %c1_i32 = arith.constant 1 : i32
    %1 = vector.broadcast %c1_i32 : i32 to vector<2x256xi32>
    %2 = arith.cmpi sge, %0, %1 : vector<2x256xi32>
    %c2_i32 = arith.constant 2 : i32
    %3 = vector.broadcast %c2_i32 : i32 to vector<2x256xi32>
    %4 = arith.cmpi sge, %0, %3 : vector<2x256xi32>
    %c0_1 = arith.constant 0 : index
    %c0_2 = arith.constant 0 : index
    %c0_3 = arith.constant 0 : index
    %5 = vector.load %arg1[%c0_1, %c0_2, %c0_3] : memref<2x4x256xf32, #tpu.memory_space<vmem>>, vector<2x1x256xf32>
    %6 = vector.shape_cast %5 : vector<2x1x256xf32> to vector<2x256xf32>
    %c0_4 = arith.constant 0 : index
    %c1 = arith.constant 1 : index
    %c0_5 = arith.constant 0 : index
    %7 = vector.load %arg1[%c0_4, %c1, %c0_5] : memref<2x4x256xf32, #tpu.memory_space<vmem>>, vector<2x1x256xf32>
    %8 = vector.shape_cast %7 : vector<2x1x256xf32> to vector<2x256xf32>
    %c0_6 = arith.constant 0 : index
    %c0_7 = arith.constant 0 : index
    %c0_8 = arith.constant 0 : index
    %9 = vector.load %arg2[%c0_6, %c0_7, %c0_8] : memref<2x2x256xf32, #tpu.memory_space<vmem>>, vector<2x1x256xf32>
    %10 = vector.shape_cast %9 : vector<2x1x256xf32> to vector<2x256xf32>
    %c0_9 = arith.constant 0 : index
    %c1_10 = arith.constant 1 : index
    %c0_11 = arith.constant 0 : index
    %11 = vector.load %arg2[%c0_9, %c1_10, %c0_11] : memref<2x2x256xf32, #tpu.memory_space<vmem>>, vector<2x1x256xf32>
    %12 = vector.shape_cast %11 : vector<2x1x256xf32> to vector<2x256xf32>
    %13 = arith.select %2, %8, %6 : vector<2x256xi1>, vector<2x256xf32>
    %14 = arith.select %4, %12, %10 : vector<2x256xi1>, vector<2x256xf32>
    %15 = vector.shape_cast %13 : vector<2x256xf32> to vector<1x2x256xf32>
    %cst = arith.constant dense<0.000000e+00> : vector<1xf32>
    %16 = vector.multi_reduction <add>, %15, %cst [1, 2] : vector<1x2x256xf32> to vector<1xf32>
    %17 = vector.shape_cast %16 : vector<1xf32> to vector<1x1x1xf32>
    %18 = vector.extract %17[0, 0, 0] : f32 from vector<1x1x1xf32>
    %c0_12 = arith.constant 0 : index
    %c0_13 = arith.constant 0 : index
    %c0_14 = arith.constant 0 : index
    %19 = vector.load %arg1[%c0_12, %c0_13, %c0_14] : memref<2x4x256xf32, #tpu.memory_space<vmem>>, vector<2x4x256xf32>
    %20 = vector.shape_cast %19 : vector<2x4x256xf32> to vector<1x2x4x256xf32>
    %cst_15 = arith.constant dense<0.000000e+00> : vector<1xf32>
    %21 = vector.multi_reduction <add>, %20, %cst_15 [1, 2, 3] : vector<1x2x4x256xf32> to vector<1xf32>
    %22 = vector.shape_cast %21 : vector<1xf32> to vector<1x1x1x1xf32>
    %23 = vector.extract %22[0, 0, 0, 0] : f32 from vector<1x1x1x1xf32>
    %24 = vector.shape_cast %14 : vector<2x256xf32> to vector<1x2x256xf32>
    %cst_16 = arith.constant dense<0.000000e+00> : vector<1xf32>
    %25 = vector.multi_reduction <add>, %24, %cst_16 [1, 2] : vector<1x2x256xf32> to vector<1xf32>
    %26 = vector.shape_cast %25 : vector<1xf32> to vector<1x1x1xf32>
    %27 = vector.extract %26[0, 0, 0] : f32 from vector<1x1x1xf32>
    %c0_17 = arith.constant 0 : index
    %c0_18 = arith.constant 0 : index
    %c0_19 = arith.constant 0 : index
    %28 = vector.load %arg2[%c0_17, %c0_18, %c0_19] : memref<2x2x256xf32, #tpu.memory_space<vmem>>, vector<2x2x256xf32>
    %29 = vector.shape_cast %28 : vector<2x2x256xf32> to vector<1x2x2x256xf32>
    %cst_20 = arith.constant dense<0.000000e+00> : vector<1xf32>
    %30 = vector.multi_reduction <add>, %29, %cst_20 [1, 2, 3] : vector<1x2x2x256xf32> to vector<1xf32>
    %31 = vector.shape_cast %30 : vector<1xf32> to vector<1x1x1x1xf32>
    %32 = vector.extract %31[0, 0, 0, 0] : f32 from vector<1x1x1x1xf32>
    %33 = vector.broadcast %18 : f32 to vector<8x128xf32>
    %c0_21 = arith.constant 0 : index
    %c0_22 = arith.constant 0 : index
    %c0_23 = arith.constant 0 : index
    %c0_24 = arith.constant 0 : index
    %34 = vector.load %arg4[%c0_21, %c0_22, %c0_23, %c0_24] : memref<1x4x8x128xf32, #tpu.memory_space<vmem>>, vector<1x1x8x128xf32>
    %35 = vector.shape_cast %34 : vector<1x1x8x128xf32> to vector<8x128xf32>
    %36 = vector.shape_cast %33 : vector<8x128xf32> to vector<1x1x8x128xf32>
    tpu.vector_store %arg4[%c0_21, %c0_22, %c0_23, %c0_24], %36 {strides = array<i32>} : memref<1x4x8x128xf32, #tpu.memory_space<vmem>>, vector<1x1x8x128xf32>,
    %37 = vector.broadcast %23 : f32 to vector<8x128xf32>
    %c0_25 = arith.constant 0 : index
    %c1_26 = arith.constant 1 : index
    %c0_27 = arith.constant 0 : index
    %c0_28 = arith.constant 0 : index
    %38 = vector.load %arg4[%c0_25, %c1_26, %c0_27, %c0_28] : memref<1x4x8x128xf32, #tpu.memory_space<vmem>>, vector<1x1x8x128xf32>
    %39 = vector.shape_cast %38 : vector<1x1x8x128xf32> to vector<8x128xf32>
    %40 = vector.shape_cast %37 : vector<8x128xf32> to vector<1x1x8x128xf32>
    tpu.vector_store %arg4[%c0_25, %c1_26, %c0_27, %c0_28], %40 {strides = array<i32>} : memref<1x4x8x128xf32, #tpu.memory_space<vmem>>, vector<1x1x8x128xf32>,
    %41 = vector.broadcast %27 : f32 to vector<8x128xf32>
    %c0_29 = arith.constant 0 : index
    %c2 = arith.constant 2 : index
    %c0_30 = arith.constant 0 : index
    %c0_31 = arith.constant 0 : index
    %42 = vector.load %arg4[%c0_29, %c2, %c0_30, %c0_31] : memref<1x4x8x128xf32, #tpu.memory_space<vmem>>, vector<1x1x8x128xf32>
    %43 = vector.shape_cast %42 : vector<1x1x8x128xf32> to vector<8x128xf32>
    %44 = vector.shape_cast %41 : vector<8x128xf32> to vector<1x1x8x128xf32>
    tpu.vector_store %arg4[%c0_29, %c2, %c0_30, %c0_31], %44 {strides = array<i32>} : memref<1x4x8x128xf32, #tpu.memory_space<vmem>>, vector<1x1x8x128xf32>,
    %45 = vector.broadcast %32 : f32 to vector<8x128xf32>
    %c0_32 = arith.constant 0 : index
    %c3 = arith.constant 3 : index
    %c0_33 = arith.constant 0 : index
    %c0_34 = arith.constant 0 : index
    %46 = vector.load %arg4[%c0_32, %c3, %c0_33, %c0_34] : memref<1x4x8x128xf32, #tpu.memory_space<vmem>>, vector<1x1x8x128xf32>
    %47 = vector.shape_cast %46 : vector<1x1x8x128xf32> to vector<8x128xf32>
    %48 = vector.shape_cast %45 : vector<8x128xf32> to vector<1x1x8x128xf32>
    tpu.vector_store %arg4[%c0_32, %c3, %c0_33, %c0_34], %48 {strides = array<i32>} : memref<1x4x8x128xf32, #tpu.memory_space<vmem>>, vector<1x1x8x128xf32>,
    return
  }
  func.func @transform_0(%arg0: i32) -> (i32, i32, i32) {
    %c0_i32 = arith.constant 0 : i32
    %c0_i32_0 = arith.constant 0 : i32
    %c0_i32_1 = arith.constant 0 : i32
    return %c0_i32, %c0_i32_0, %arg0 : i32, i32, i32
  }
  func.func @transform_1(%arg0: i32) -> (i32, i32, i32) {
    %c0_i32 = arith.constant 0 : i32
    %c0_i32_0 = arith.constant 0 : i32
    %c0_i32_1 = arith.constant 0 : i32
    return %c0_i32, %c0_i32_0, %arg0 : i32, i32, i32
  }
  func.func @transform_2(%arg0: i32) -> (i32, i32) {
    %c0_i32 = arith.constant 0 : i32
    %c0_i32_0 = arith.constant 0 : i32
    return %c0_i32, %arg0 : i32, i32
  }
  func.func @transform_3(%arg0: i32) -> (i32, i32, i32, i32) {
    %c0_i32 = arith.constant 0 : i32
    %c0_i32_0 = arith.constant 0 : i32
    %c0_i32_1 = arith.constant 0 : i32
    %c0_i32_2 = arith.constant 0 : i32
    return %arg0, %c0_i32, %c0_i32_0, %c0_i32_1 : i32, i32, i32, i32
  }
}

</mosaic_0001>

<bundles_post_ra>
// kernel: tpu_custom_call.1
= control target key start
LH: loop header
LB: loop body
LE: loop exit
PB: predicated region body
PF: predicated region fallthrough
CT: control target
= control target key end

     0   :  { %8 = vsyncpa [#allocation3], 0  ;;  %s428_s0 = inlined_call_operand.hbm [shape: f32[2,4,256], index: 0, kind: input, shape index: {}]   ;;  %s429_s1 = inlined_call_operand.hbm [shape: f32[2,2,256], index: 1, kind: input, shape index: {}]   ;;  %s430_s2 = inlined_call_operand.hbm [shape: s32[2,256], index: 2, kind: input, shape index: {}]   ;;  %s431_s3 = inlined_call_operand.hbm [shape: f32[1,4,8,128], index: 3, kind: output, shape index: {}]  }
   0x1   :  { %9 = vsyncpa [#allocation6], 0 }
   0x2   :  { %10 = vsyncpa [#allocation4], 0  ;;  %s366_s12 = smov [#allocation5]  }
   0x3   :  { %s28_s13 = sshll.u32 %s366_s12, 4  ;;  %s29_s13 = int_to_ptr.vmem [resolvable:$true] %s28_s13 }
   0x4   :  { %s288_s14 = scalar_lea.vmem %s29_s13, 128  ;;  %p293_p1 = scmp.lt.s32.totalorder %s29_s13, %s29_s13 }
   0x5   :  { %p289_p0 = scmp.ne.s32.totalorder %s29_s13, %s288_s14  ;;  %p294_p2 = scmp.lt.s32.totalorder %s288_s14, %s288_s14 }
   0x7   :  { %p295_p3 = por %p294_p2, %p293_p1 }
   0x9   :  { %p296_p4 = pnand %p295_p3, %p289_p0 }
   0xb   :  { %299 = shalt.err (!%p296_p4)
}
   0xc   :  { %s367_s15 = smov 64   ;;  %s368_s16 = smov 4  }
   0xd   :  { %34 = dma.hbm_to_vmem [thread:$0]  %s429_s1, 128, %s29_s13, [#allocation6], %s367_s15, %s367_s15, %s368_s16  }
   0xe   :  { %s369_s19 = smov [#allocation2]  }
   0xf   :  { %s16_s20 = sshll.u32 %s369_s19, 4  ;;  %s17_s20 = int_to_ptr.vmem [resolvable:$true] %s16_s20 }
  0x10   :  { %s308_s21 = scalar_lea.vmem %s17_s20, 256  ;;  %p313_p6 = scmp.lt.s32.totalorder %s17_s20, %s17_s20 }
  0x11   :  { %p309_p5 = scmp.ne.s32.totalorder %s17_s20, %s308_s21  ;;  %p314_p7 = scmp.lt.s32.totalorder %s308_s21, %s308_s21 }
  0x13   :  { %p315_p8 = por %p314_p7, %p313_p6 }
  0x15   :  { %p316_p9 = pnand %p315_p8, %p309_p5 }
  0x17   :  { %319 = shalt.err (!%p316_p9)
}
  0x18   :  { %s370_s22 = smov 128   ;;  %s371_s23 = smov 8  }
  0x19   :  { %22 = dma.hbm_to_vmem [thread:$0]  %s428_s0, 256, %s17_s20, [#allocation3], %s370_s22, %s370_s22, %s371_s23  }
  0x1a   :  { %s372_s1 = smov [#allocation7]  }
  0x1b   :  { %s41_s26 = sshll.u32 %s372_s1, 4  ;;  %s42_s26 = int_to_ptr.vmem [resolvable:$true] %s41_s26 }
  0x1c   :  { %s328_s27 = scalar_lea.vmem %s42_s26, 64  ;;  %p333_p11 = scmp.lt.s32.totalorder %s42_s26, %s42_s26 }
  0x1d   :  { %p329_p10 = scmp.ne.s32.totalorder %s42_s26, %s328_s27  ;;  %p334_p12 = scmp.lt.s32.totalorder %s328_s27, %s328_s27 }
  0x1f   :  { %p335_p13 = por %p334_p12, %p333_p11 }
  0x21   :  { %p336_p0 = pnand %p335_p13, %p329_p10 }
  0x23   :  { %339 = shalt.err (!%p336_p0)
}
  0x24   :  { %44 = dma.hbm_to_vmem [thread:$0]  %s430_s2, 64, %s42_s26, [#allocation6]  }
  0x25   :  { %360 = dma.done.wait [#allocation3], 256  }
  0x26   :  { %361 = vsyncadd [#allocation3], 4294967040 }
  0x27   :  { %362 = dma.done.wait [#allocation6], 192  }
  0x28   :  { %363 = vsyncadd [#allocation6], 4294967104  ;;  %v77_v0 = vlaneseq  ;;  %v373_v1 = vmov 1935823168   ;;  %v374_v5 = vmov 1983009808  }
  0x29   :  { %v75_v2 = vunpack.c.l.s4 %v373_v1  ;;  %v119_v6 = vunpack.c.l.s4 %v374_v5  ;;  %vm128_vm0 = vcmask 1041408   ;;  %v54_v7 = vld [vmem:[#allocation7] sm:$0xf]  ;;  %v64_v8 = vld [vmem:[#allocation5] ss:$2 sm:$0x3] }
  0x2a   :  { %v78_v4 = vshrl.u32 %v77_v0, 7  ;;  %v141_v11 = vld [vmem:[#allocation2] sm:$0xff]  ;;  %vm56_vm1 = vcmp.ge.s32.totalorder %v54_v7, 2  ;;  %v66_v12 = vld [vmem:[#allocation5 + $0x4] ss:$2 sm:$0x3] }
  0x2b   :  { %v76_v3 = vunpack.c.0.s8 %v75_v2  ;;  %v120_v10 = vunpack.c.0.s8 %v119_v6  ;;  %vm55_vm2 = vcmp.ge.s32.totalorder %v54_v7, 1  ;;  %vm149_vm3 = vcmask 1043456   ;;  %v68_v13 = vld [vmem:[#allocation5 + $0x1] ss:$2 sm:$0x3]  ;;  %v142_v28 = vld [vmem:[#allocation2 + $0x8] sm:$0xff] }
  0x2c   :  { %v70_v14 = vld [vmem:[#allocation5 + $0x5] ss:$2 sm:$0x3]  ;;  %v107_v15 = vcombine.low %v64_v8, %v66_v12  ;;  %v145_v16 = vcombine.high %v141_v11, %v141_v11  ;;  %v57_v18 = vld [vmem:[#allocation2] ss:$4 sm:$0x3]  ;;  %v146_v43 = vcombine.high %v142_v28, %v142_v28 }
  0x2d   :  { %v79_v9 = vsub.s32 %v76_v3, %v78_v4  ;;  %v96_v17 = vcombine.low %v68_v13, %v70_v14  ;;  %v59_v19 = vld [vmem:[#allocation2 + $0x8] ss:$4 sm:$0x3]  ;;  %v123_v21 = vsub.s32 %v120_v10, %v78_v4  ;;  %v61_v22 = vld [vmem:[#allocation2 + $0x1] ss:$4 sm:$0x3] }
  0x2e   :  { %v63_v23 = vld [vmem:[#allocation2 + $0x9] ss:$4 sm:$0x3]  ;;  %v84_v24 = vcombine.low %v57_v18, %v59_v19  ;;  %v150_v29 = vsel %vm149_vm3, %v141_v11, 0.0  ;;  %v151_v34 = vsel %vm149_vm3, %v145_v16, 0.0  ;;  %v153_v48 = vsel %vm149_vm3, %v142_v28, 0.0 }
  0x2f   :  { %v114_v20 = vrot.slane %v107_v15, %v79_v9  ;;  %v103_v25 = vrot.slane %v96_v17, %v79_v9  ;;  %v73_v26 = vcombine.low %v61_v22, %v63_v23  ;;  %v258_v27 = vld.sshfl [vmem:[#allocation5] sm:$0x33 pattern:$0x76325410]  ;;  %v152_v44 = vadd.f32 %v151_v34, %v150_v29  ;;  %s375_s2 = smov [#allocation8]  }
  0x30   :  { %v91_v30 = vrot.slane %v84_v24, %v79_v9  ;;  %v259_v31 = vld.sshfl [vmem:[#allocation5 + $0x4] sm:$0x33 pattern:$0x76325410]  ;;  %v200_v32 = vcombine.high %v258_v27, %v258_v27  ;;  %v213_v33 = vsel %vm128_vm0, %v258_v27, 0.0  ;;  %v155_v57 = vsel %vm149_vm3, %v146_v43, 0.0 }
  0x31   :  { %v116_v35 = vsel %vm56_vm1, %v103_v25, %v114_v20  ;;  %v80_v36 = vrot.slane %v73_v26, %v79_v9  ;;  %v208_v38 = vcombine.high %v259_v31, %v259_v31  ;;  %v216_v40 = vsel %vm128_vm0, %v259_v31, 0.0  ;;  %s245_s30 = sshll.u32 %s375_s2, 4  ;;  %s246_s30 = int_to_ptr.vmem [resolvable:$true] %s245_s30 }
  0x32   :  { %v173_v37 = vrot.slane %v116_v35, %v123_v21  ;;  %v214_v39 = vsel %vm128_vm0, %v200_v32, 0.0  ;;  %v154_v55 = vadd.f32 %v153_v48, %v152_v44  ;;  %s340_s7 = scalar_lea.vmem %s246_s30, 512  ;;  %p345_p2 = scmp.lt.s32.totalorder %s246_s30, %s246_s30 }
  0x33   :  { %v93_v41 = vsel %vm55_vm2, %v80_v36, %v91_v30  ;;  %v215_v42 = vadd.f32 %v214_v39, %v213_v33  ;;  %v218_v53 = vsel %vm128_vm0, %v208_v38, 0.0  ;;  %p341_p1 = scmp.ne.s32.totalorder %s246_s30, %s340_s7  ;;  %p346_p3 = scmp.lt.s32.totalorder %s340_s7, %s340_s7 }
  0x34   :  { %v174_v45 = vcombine.high %v173_v37, %v173_v37  ;;  %v177_v46 = vsel %vm128_vm0, %v173_v37, 0.0  ;;  %v124_v47 = vrot.slane %v93_v41, %v123_v21  ;;  %v156_v60 = vadd.f32 %v155_v57, %v154_v55 }
  0x35   :  { %v217_v49 = vadd.f32 %v216_v40, %v215_v42  ;;  %p347_p4 = por %p346_p3, %p345_p2 }
  0x36   :  { %v178_v50 = vsel %vm128_vm0, %v174_v45, 0.0  ;;  %v125_v51 = vcombine.high %v124_v47, %v124_v47  ;;  %v129_v52 = vsel %vm128_vm0, %v124_v47, 0.0 }
  0x37   :  { %v179_v54 = vadd.f32 %v178_v50, %v177_v46  ;;  %v219_v59 = vadd.f32 %v218_v53, %v217_v49  ;;  %p348_p5 = pnand %p347_p4, %p341_p1 }
  0x38   :  { %v130_v56 = vsel %vm128_vm0, %v125_v51, 0.0 }
  0x39   :  { %180 = vadd.xlane.f32.xlu1 %v179_v54  ;;  %v131_v58 = vadd.f32 %v130_v56, %v129_v52 }
  0x3b   :  { %132 = vadd.xlane.f32.xlu0 %v131_v58 }
  0x3d   :  { %220 = vadd.xlane.f32.xlu1 %v219_v59 }
  0x3f   :  { %157 = vadd.xlane.f32.xlu0 %v156_v60 }
  0xc2   :  { %v181_v61 = vpop.xlane.xlu1 %180 }
  0xc3   :  { %v182_v62 = vrot.slane %v181_v61, 4 }
  0xc4   :  { %v133_v63 = vpop.xlane.xlu0 %132 }
  0xc5   :  { %v183_v0 = vadd.f32 %v182_v62, %v181_v61  ;;  %v134_v1 = vrot.slane %v133_v63, 4 }
  0xc6   :  { %v221_v2 = vpop.xlane.xlu1 %220 }
  0xc7   :  { %v135_v3 = vadd.f32 %v134_v1, %v133_v63  ;;  %v222_v4 = vrot.slane %v221_v2, 4  ;;  %v184_v5 = vrot.slane %v183_v0, 2 }
  0xc8   :  { %v158_v6 = vpop.xlane.xlu0 %157 }
  0xc9   :  { %v136_v7 = vrot.slane %v135_v3, 2  ;;  %v223_v8 = vadd.f32 %v222_v4, %v221_v2  ;;  %v159_v9 = vrot.slane %v158_v6, 4  ;;  %v185_v13 = vadd.f32 %v184_v5, %v183_v0 }
  0xcb   :  { %v224_v10 = vrot.slane %v223_v8, 2  ;;  %v160_v11 = vadd.f32 %v159_v9, %v158_v6  ;;  %v137_v12 = vadd.f32 %v136_v7, %v135_v3  ;;  %v186_v20 = vrot.slane %v185_v13, 1 }
  0xcd   :  { %v225_v14 = vadd.f32 %v224_v10, %v223_v8  ;;  %v161_v15 = vrot.slane %v160_v11, 2  ;;  %v138_v16 = vrot.slane %v137_v12, 1  ;;  %v187_v24 = vadd.f32 %v186_v20, %v185_v13 }
  0xcf   :  { %v162_v17 = vadd.f32 %v161_v15, %v160_v11  ;;  %v139_v18 = vadd.f32 %v138_v16, %v137_v12  ;;  %v226_v19 = vrot.slane %v225_v14, 1 }
  0xd1   :  { %260 = vpush %v139_v18  ;;  %v163_v21 = vrot.slane %v162_v17, 1  ;;  %v227_v23 = vadd.f32 %v226_v19, %v225_v14 }
  0xd3   :  { %v164_v22 = vadd.f32 %v163_v21, %v162_v17 }
  0xd5   :  { %262 = vpush %v164_v22 }
  0xd6   :  { %264 = vpush %v187_v24 }
  0xd7   :  { %266 = vpush %v227_v23 }
 0x102   :  { %s261_s0 = spop %260 }
 0x103   :  { %v229_v25 = vstv %s261_s0 }
 0x104   :  { %230 = vst [vmem:[#allocation8] sm:$0xff] %v229_v25 }
 0x106   :  { %s263_s4 = spop %262 }
 0x107   :  { %v231_v26 = vstv %s263_s4  ;;  %s265_s5 = spop %264 }
 0x108   :  { %233 = vst [vmem:[#allocation8 + $0x8] sm:$0xff] %v231_v26  ;;  %v234_v27 = vstv %s265_s5  ;;  %s267_s6 = spop %266 }
 0x109   :  { %236 = vst [vmem:[#allocation8 + $0x10] sm:$0xff] %v234_v27  ;;  %v237_v28 = vstv %s267_s6 }
 0x10a   :  { %239 = vst [vmem:[#allocation8 + $0x18] sm:$0xff] %v237_v28 }
 0x10b   :  { %351 = shalt.err (!%p348_p5)
}
 0x10c   :  { %251 = dma.vmem_to_hbm [thread:$0]  %s246_s30, 512, %s431_s3, [#allocation4], %s370_s22, %s370_s22, %s371_s23  }
 0x10d   :  { %364 = dma.done.wait [#allocation4], 512  }
 0x10e   :  { %365 = vsyncadd [#allocation4], 4294966784 }
 0x10f   :  { %255 = vsyncpa [#allocation3], 1 }
 0x110   :  { %256 = vsyncpa [#allocation6], 1 }
 0x111   :  { %257 = vsyncpa [#allocation4], 1 }

</bundles_post_ra>
